<compile_context>
chip_gen: v7x
topology: tpu7x:2x2x1
jax: 0.10.0
libtpu: 0.0.40
codegen_flags: <defaults>
</compile_context>

<pallas_src>
import functools

import jax
import jax.numpy as jnp
from jax import lax
from jax.experimental import pallas as pl
from jax.experimental.pallas import tpu as pltpu


def _mb_block_kernel(x_ref, wdw_ref, b1_ref, wpw_ref, b2_ref, o_ref,
                     *, H, W, Cin, Cout):
    """Nb batch images per grid step, flattened-spatial (lane-dense) layout.

    x_ref  : (Nb, Cin, H*W)  input, spatial flattened onto the lane axis
    wdw_ref: (9, Cin, 1)     depthwise 3x3 weights * BN1 scale, k = kh*3 + kw
    b1_ref : (Cin, 1)        folded BN1 bias
    wpw_ref: (Cin, Cout, 1)  pointwise weights * BN2 scale (Cin-major)
    b2_ref : (Cout, 1)       folded BN2 bias
    o_ref  : (Nb, Cout, H*W)
    """
    HW = H * W
    x = x_ref[...].astype(jnp.float32)                       # (Nb, Cin, HW)

    # Edge masks on the flattened spatial (lane) axis.
    p = lax.broadcasted_iota(jnp.int32, (1, 1, HW), 2)
    w_idx = p % W
    col_first = w_idx == 0                 # w == 0    -> dw = -1 tap invalid
    col_last = w_idx == (W - 1)            # w == W-1  -> dw = +1 tap invalid
    row_first = p < W                      # h == 0    -> dh = -1 taps invalid
    row_last = p >= (H - 1) * W            # h == H-1  -> dh = +1 taps invalid

    # Hoisted column (lane) shifts with zero-fill at the image edge.
    # xw{0,1,2}[p] = x[h, w + dw] for dw = -1, 0, +1 (0 outside the image).
    xw0 = jnp.where(col_first, 0.0, pltpu.roll(x, shift=1, axis=2))
    xw1 = x
    xw2 = jnp.where(col_last, 0.0, pltpu.roll(x, shift=HW - 1, axis=2))

    # Depthwise 3x3 as three row-partials.  Weights are per-channel scalars
    # (lane-uniform), so the row shift commutes with the weighted sum:
    # only 2 row rolls + 2 row masks are needed for all 6 off-row taps.
    # BN1 bias is folded into the dh=0 partial's init.
    part0 = xw0 * wdw_ref[3] + b1_ref[...]                    # kh = 1 (dh = 0)
    part0 = part0 + xw1 * wdw_ref[4]
    part0 = part0 + xw2 * wdw_ref[5]

    pm1 = xw0 * wdw_ref[0] + xw1 * wdw_ref[1] + xw2 * wdw_ref[2]   # kh = 0
    pm1 = jnp.where(row_first, 0.0, pltpu.roll(pm1, shift=W, axis=2))

    pp1 = xw0 * wdw_ref[6] + xw1 * wdw_ref[7] + xw2 * wdw_ref[8]   # kh = 2
    pp1 = jnp.where(row_last, 0.0, pltpu.roll(pp1, shift=HW - W, axis=2))

    # BN1 (scale already folded into the weights) + ReLU.
    h1 = jnp.maximum(part0 + pm1 + pp1, 0.0)                  # (Nb, Cin, HW)

    # Pointwise 1x1: VPU broadcast-MAC over Cin (K = Cin far too small to
    # feed the MXU at this size); BN2 bias folded into the first MAC.
    h2 = h1[:, 0:1, :] * wpw_ref[0] + b2_ref[...]             # (Nb, Cout, HW)
    for ci in range(1, Cin):
        h2 = h2 + h1[:, ci:ci + 1, :] * wpw_ref[ci]

    # BN2 (folded) + ReLU.
    o_ref[...] = jnp.maximum(h2, 0.0).astype(o_ref.dtype)


def mb_block_pallas(x_nchw, w_dw, w_pw, scale1, bias1, scale2, bias2,
                    *, stride=1, activation="relu"):
    """x_nchw: (N, Cin, H, W) float32
       w_dw  : (Cin, 1, 3, 3)    depthwise conv weight (PyTorch layout)
       w_pw  : (Cout, Cin, 1, 1) pointwise conv weight (PyTorch layout)
       scale*/bias*: folded eval-mode BatchNorm affine parameters.
    Returns (N, Cout, H, W)."""
    if stride != 1:
        raise NotImplementedError("MbBlock Pallas kernel: only stride=1 is implemented")
    if activation != "relu":
        raise NotImplementedError("MbBlock Pallas kernel: only 'relu' is implemented")

    N, Cin, H, W = x_nchw.shape
    Cout = w_pw.shape[0]
    HW = H * W

    # Lane-dense layout: NCHW -> (N, Cin, H*W) is a free contiguous reshape.
    x_flat = x_nchw.reshape(N, Cin, HW)

    # Fold BN scales into the conv weights (zero runtime cost); keep the
    # weights/biases compact -- the broadcast happens once inside the kernel.
    wdw_f = w_dw[:, 0, :, :] * scale1[:, None, None]                  # (Cin,3,3)
    wdw9 = jnp.transpose(wdw_f, (1, 2, 0)).reshape(9, Cin)[:, :, None]  # (9,Cin,1)
    b1c = bias1[:, None]                                              # (Cin,1)

    wpw_f = w_pw[:, :, 0, 0] * scale2[:, None]                        # (Cout,Cin)
    wpwc = jnp.transpose(wpw_f)[:, :, None]                           # (Cin,Cout,1)
    b2c = bias2[:, None]                                              # (Cout,1)

    # Batch blocking: amortize the ~0.35 us per-grid-step overhead by moving
    # several images per step (target ~2 MiB per input block) while keeping
    # double-buffered blocks far below every generation's VMEM limit.
    per_image_bytes = Cin * HW * x_nchw.dtype.itemsize
    target_bytes = 2 * 1024 * 1024
    Nb = 1
    for d in range(1, N + 1):
        if N % d == 0 and d * per_image_bytes <= target_bytes:
            Nb = d
    grid = (N // Nb,)

    kernel = functools.partial(_mb_block_kernel, H=H, W=W, Cin=Cin, Cout=Cout)

    out_flat = pl.pallas_call(
        kernel,
        out_shape=jax.ShapeDtypeStruct((N, Cout, HW), x_nchw.dtype),
        grid_spec=pltpu.PrefetchScalarGridSpec(
            num_scalar_prefetch=0,
            grid=grid,
            in_specs=[
                pl.BlockSpec((Nb, Cin, HW), lambda n: (n, 0, 0)),
                pl.BlockSpec((9, Cin, 1), lambda n: (0, 0, 0)),
                pl.BlockSpec((Cin, 1), lambda n: (0, 0)),
                pl.BlockSpec((Cin, Cout, 1), lambda n: (0, 0, 0)),
                pl.BlockSpec((Cout, 1), lambda n: (0, 0)),
            ],
            out_specs=pl.BlockSpec((Nb, Cout, HW), lambda n: (n, 0, 0)),
        ),
        compiler_params=pltpu.CompilerParams(
            dimension_semantics=("parallel",)),
    )(x_flat, wdw9, b1c, wpwc, b2c)

    return out_flat.reshape(N, Cout, H, W)


def _reference(x_nchw, w_dw, w_pw, scale1, bias1, scale2, bias2):
    """Pure-JAX reference matching PyTorch semantics (eval-mode BN)."""
    Cin = x_nchw.shape[1]
    dn = lax.conv_dimension_numbers(x_nchw.shape, w_dw.shape,
                                    ("NCHW", "OIHW", "NCHW"))
    h = lax.conv_general_dilated(x_nchw, w_dw, (1, 1), ((1, 1), (1, 1)),
                                 dimension_numbers=dn,
                                 feature_group_count=Cin)
    h = h * scale1[None, :, None, None] + bias1[None, :, None, None]
    h = jnp.maximum(h, 0.0)
    dn2 = lax.conv_dimension_numbers(h.shape, w_pw.shape,
                                     ("NCHW", "OIHW", "NCHW"))
    h = lax.conv_general_dilated(h, w_pw, (1, 1), ((0, 0), (0, 0)),
                                 dimension_numbers=dn2)
    h = h * scale2[None, :, None, None] + bias2[None, :, None, None]
    return jnp.maximum(h, 0.0)


if __name__ == "__main__":
    # Small, deterministic setup: N=2, Cin=4, H=W=16, Cout=8, stride=1.
    N, Cin, H, W, Cout = 2, 4, 16, 16, 8
    key = jax.random.PRNGKey(0)
    kx, kdw, kpw = jax.random.split(key, 3)

    x = jax.random.normal(kx, (N, Cin, H, W), dtype=jnp.float32)
    w_dw = jax.random.normal(kdw, (Cin, 1, 3, 3), dtype=jnp.float32) * 0.2
    w_pw = jax.random.normal(kpw, (Cout, Cin, 1, 1), dtype=jnp.float32) * 0.2

    # Deterministic BatchNorm parameters (eval mode), folded to scale/bias.
    eps = 1e-5
    gamma1 = 1.0 + 0.10 * jnp.arange(Cin, dtype=jnp.float32)
    beta1 = 0.05 * jnp.arange(Cin, dtype=jnp.float32)
    mean1 = 0.01 * jnp.arange(Cin, dtype=jnp.float32)
    var1 = 1.0 + 0.02 * jnp.arange(Cin, dtype=jnp.float32)
    scale1 = gamma1 / jnp.sqrt(var1 + eps)
    bias1 = beta1 - mean1 * scale1

    gamma2 = 1.0 + 0.05 * jnp.arange(Cout, dtype=jnp.float32)
    beta2 = -0.03 * jnp.arange(Cout, dtype=jnp.float32)
    mean2 = 0.02 * jnp.arange(Cout, dtype=jnp.float32)
    var2 = 1.0 + 0.01 * jnp.arange(Cout, dtype=jnp.float32)
    scale2 = gamma2 / jnp.sqrt(var2 + eps)
    bias2 = beta2 - mean2 * scale2

    out = mb_block_pallas(x, w_dw, w_pw, scale1, bias1, scale2, bias2)
    out = jax.block_until_ready(out)

    ref = _reference(x, w_dw, w_pw, scale1, bias1, scale2, bias2)
    assert out.shape == (N, Cout, H, W)
    assert jnp.allclose(out, ref, atol=1e-4, rtol=1e-4), "mismatch vs reference"

    print("KERNEL_OK")
</pallas_src>

<mosaic_0001>
module attributes {stable_mosaic.version = 11 : i64} {
  func.func @_mb_block_kernel(%arg0: i32, %arg1: memref<2x4x256xf32, #tpu.memory_space<vmem>>, %arg2: memref<9x4x1xf32, #tpu.memory_space<vmem>>, %arg3: memref<4x1xf32, #tpu.memory_space<vmem>>, %arg4: memref<4x8x1xf32, #tpu.memory_space<vmem>>, %arg5: memref<8x1xf32, #tpu.memory_space<vmem>>, %arg6: memref<2x8x256xf32, #tpu.memory_space<vmem>>) attributes {dimension_semantics = [#tpu.dimension_semantics<parallel>], iteration_bounds = array<i64: 1>, scalar_prefetch = 0 : i64, scratch_operands = 0 : i64, tpu.core_type = #tpu.core_type<tc>, window_params = [{transform_indices = @transform_0, window_bounds = array<i64: 2, 4, 256>}, {pipeline_mode = #tpu.pipeline_mode<synchronous>, transform_indices = @transform_1, window_bounds = array<i64: 9, 4, 1>}, {pipeline_mode = #tpu.pipeline_mode<synchronous>, transform_indices = @transform_2, window_bounds = array<i64: 4, 1>}, {pipeline_mode = #tpu.pipeline_mode<synchronous>, transform_indices = @transform_3, window_bounds = array<i64: 4, 8, 1>}, {pipeline_mode = #tpu.pipeline_mode<synchronous>, transform_indices = @transform_4, window_bounds = array<i64: 8, 1>}, {transform_indices = @transform_5, window_bounds = array<i64: 2, 8, 256>}]} {
    %c0 = arith.constant 0 : index
    %c0_0 = arith.constant 0 : index
    %c0_1 = arith.constant 0 : index
    %0 = vector.load %arg1[%c0, %c0_0, %c0_1] : memref<2x4x256xf32, #tpu.memory_space<vmem>>, vector<2x4x256xf32>
    %1 = tpu.iota {dimensions = array<i32: 2>} : vector<1x1x256xi32>
    %c16_i32 = arith.constant 16 : i32
    %c0_i32 = arith.constant 0 : i32
    %2 = arith.cmpi eq, %c16_i32, %c0_i32 : i32
    %c1_i32 = arith.constant 1 : i32
    %3 = arith.select %2, %c1_i32, %c16_i32 : i32
    %4 = vector.broadcast %3 : i32 to vector<1x1x256xi32>
    %5 = arith.remsi %1, %4 : vector<1x1x256xi32>
    %c0_i32_2 = arith.constant 0 : i32
    %6 = vector.broadcast %c0_i32_2 : i32 to vector<1x1x256xi32>
    %7 = arith.cmpi ne, %5, %6 : vector<1x1x256xi32>
    %c0_i32_3 = arith.constant 0 : i32
    %8 = vector.broadcast %c0_i32_3 : i32 to vector<1x1x256xi32>
    %9 = arith.cmpi slt, %5, %8 : vector<1x1x256xi32>
    %c0_i32_4 = arith.constant 0 : i32
    %10 = arith.cmpi slt, %3, %c0_i32_4 : i32
    %11 = vector.broadcast %10 : i1 to vector<1x1x256xi1>
    %12 = vector.broadcast %11 : vector<1x1x256xi1> to vector<1x1x256xi1>
    %13 = arith.xori %9, %12 : vector<1x1x256xi1>
    %14 = arith.andi %13, %7 : vector<1x1x256xi1>
    %15 = vector.broadcast %3 : i32 to vector<1x1x256xi32>
    %16 = arith.addi %5, %15 : vector<1x1x256xi32>
    %17 = arith.select %14, %16, %5 : vector<1x1x256xi1>, vector<1x1x256xi32>
    %c0_i32_5 = arith.constant 0 : i32
    %18 = vector.broadcast %c0_i32_5 : i32 to vector<1x1x256xi32>
    %19 = arith.cmpi eq, %17, %18 : vector<1x1x256xi32>
    %c15_i32 = arith.constant 15 : i32
    %20 = vector.broadcast %c15_i32 : i32 to vector<1x1x256xi32>
    %21 = arith.cmpi eq, %17, %20 : vector<1x1x256xi32>
    %c16_i32_6 = arith.constant 16 : i32
    %22 = vector.broadcast %c16_i32_6 : i32 to vector<1x1x256xi32>
    %23 = arith.cmpi slt, %1, %22 : vector<1x1x256xi32>
    %c240_i32 = arith.constant 240 : i32
    %24 = vector.broadcast %c240_i32 : i32 to vector<1x1x256xi32>
    %25 = arith.cmpi sge, %1, %24 : vector<1x1x256xi32>
    %c1_i32_7 = arith.constant 1 : i32
    %26 = tpu.dynamic_rotate %0 by %c1_i32_7 dim 2 : vector<2x4x256xf32>, i32 -> vector<2x4x256xf32>
    %cst = arith.constant 0.000000e+00 : f32
    %27 = vector.shape_cast %19 : vector<1x1x256xi1> to vector<1x1x256xi1>
    %28 = vector.broadcast %27 : vector<1x1x256xi1> to vector<2x4x256xi1>
    %29 = vector.broadcast %cst : f32 to vector<2x4x256xf32>
    %30 = arith.select %28, %29, %26 : vector<2x4x256xi1>, vector<2x4x256xf32>
    %c255_i32 = arith.constant 255 : i32
    %31 = tpu.dynamic_rotate %0 by %c255_i32 dim 2 : vector<2x4x256xf32>, i32 -> vector<2x4x256xf32>
    %cst_8 = arith.constant 0.000000e+00 : f32
    %32 = vector.shape_cast %21 : vector<1x1x256xi1> to vector<1x1x256xi1>
    %33 = vector.broadcast %32 : vector<1x1x256xi1> to vector<2x4x256xi1>
    %34 = vector.broadcast %cst_8 : f32 to vector<2x4x256xf32>
    %35 = arith.select %33, %34, %31 : vector<2x4x256xi1>, vector<2x4x256xf32>
    %c3 = arith.constant 3 : index
    %c0_9 = arith.constant 0 : index
    %c0_10 = arith.constant 0 : index
    %36 = vector.load %arg2[%c3, %c0_9, %c0_10] : memref<9x4x1xf32, #tpu.memory_space<vmem>>, vector<1x4x1xf32>
    %37 = vector.shape_cast %36 : vector<1x4x1xf32> to vector<4x1xf32>
    %38 = vector.shape_cast %37 : vector<4x1xf32> to vector<1x4x1xf32>
    %39 = vector.broadcast %38 : vector<1x4x1xf32> to vector<2x4x256xf32>
    %40 = arith.mulf %30, %39 : vector<2x4x256xf32>
    %c0_11 = arith.constant 0 : index
    %c0_12 = arith.constant 0 : index
    %41 = vector.load %arg3[%c0_11, %c0_12] : memref<4x1xf32, #tpu.memory_space<vmem>>, vector<4x1xf32>
    %42 = vector.shape_cast %41 : vector<4x1xf32> to vector<1x4x1xf32>
    %43 = vector.broadcast %42 : vector<1x4x1xf32> to vector<2x4x256xf32>
    %44 = arith.addf %40, %43 : vector<2x4x256xf32>
    %c4 = arith.constant 4 : index
    %c0_13 = arith.constant 0 : index
    %c0_14 = arith.constant 0 : index
    %45 = vector.load %arg2[%c4, %c0_13, %c0_14] : memref<9x4x1xf32, #tpu.memory_space<vmem>>, vector<1x4x1xf32>
    %46 = vector.shape_cast %45 : vector<1x4x1xf32> to vector<4x1xf32>
    %47 = vector.shape_cast %46 : vector<4x1xf32> to vector<1x4x1xf32>
    %48 = vector.broadcast %47 : vector<1x4x1xf32> to vector<2x4x256xf32>
    %49 = arith.mulf %0, %48 : vector<2x4x256xf32>
    %50 = arith.addf %44, %49 : vector<2x4x256xf32>
    %c5 = arith.constant 5 : index
    %c0_15 = arith.constant 0 : index
    %c0_16 = arith.constant 0 : index
    %51 = vector.load %arg2[%c5, %c0_15, %c0_16] : memref<9x4x1xf32, #tpu.memory_space<vmem>>, vector<1x4x1xf32>
    %52 = vector.shape_cast %51 : vector<1x4x1xf32> to vector<4x1xf32>
    %53 = vector.shape_cast %52 : vector<4x1xf32> to vector<1x4x1xf32>
    %54 = vector.broadcast %53 : vector<1x4x1xf32> to vector<2x4x256xf32>
    %55 = arith.mulf %35, %54 : vector<2x4x256xf32>
    %56 = arith.addf %50, %55 : vector<2x4x256xf32>
    %c0_17 = arith.constant 0 : index
    %c0_18 = arith.constant 0 : index
    %c0_19 = arith.constant 0 : index
    %57 = vector.load %arg2[%c0_17, %c0_18, %c0_19] : memref<9x4x1xf32, #tpu.memory_space<vmem>>, vector<1x4x1xf32>
    %58 = vector.shape_cast %57 : vector<1x4x1xf32> to vector<4x1xf32>
    %59 = vector.shape_cast %58 : vector<4x1xf32> to vector<1x4x1xf32>
    %60 = vector.broadcast %59 : vector<1x4x1xf32> to vector<2x4x256xf32>
    %61 = arith.mulf %30, %60 : vector<2x4x256xf32>
    %c1 = arith.constant 1 : index
    %c0_20 = arith.constant 0 : index
    %c0_21 = arith.constant 0 : index
    %62 = vector.load %arg2[%c1, %c0_20, %c0_21] : memref<9x4x1xf32, #tpu.memory_space<vmem>>, vector<1x4x1xf32>
    %63 = vector.shape_cast %62 : vector<1x4x1xf32> to vector<4x1xf32>
    %64 = vector.shape_cast %63 : vector<4x1xf32> to vector<1x4x1xf32>
    %65 = vector.broadcast %64 : vector<1x4x1xf32> to vector<2x4x256xf32>
    %66 = arith.mulf %0, %65 : vector<2x4x256xf32>
    %67 = arith.addf %61, %66 : vector<2x4x256xf32>
    %c2 = arith.constant 2 : index
    %c0_22 = arith.constant 0 : index
    %c0_23 = arith.constant 0 : index
    %68 = vector.load %arg2[%c2, %c0_22, %c0_23] : memref<9x4x1xf32, #tpu.memory_space<vmem>>, vector<1x4x1xf32>
    %69 = vector.shape_cast %68 : vector<1x4x1xf32> to vector<4x1xf32>
    %70 = vector.shape_cast %69 : vector<4x1xf32> to vector<1x4x1xf32>
    %71 = vector.broadcast %70 : vector<1x4x1xf32> to vector<2x4x256xf32>
    %72 = arith.mulf %35, %71 : vector<2x4x256xf32>
    %73 = arith.addf %67, %72 : vector<2x4x256xf32>
    %c16_i32_24 = arith.constant 16 : i32
    %74 = tpu.dynamic_rotate %73 by %c16_i32_24 dim 2 : vector<2x4x256xf32>, i32 -> vector<2x4x256xf32>
    %cst_25 = arith.constant 0.000000e+00 : f32
    %75 = vector.shape_cast %23 : vector<1x1x256xi1> to vector<1x1x256xi1>
    %76 = vector.broadcast %75 : vector<1x1x256xi1> to vector<2x4x256xi1>
    %77 = vector.broadcast %cst_25 : f32 to vector<2x4x256xf32>
    %78 = arith.select %76, %77, %74 : vector<2x4x256xi1>, vector<2x4x256xf32>
    %c6 = arith.constant 6 : index
    %c0_26 = arith.constant 0 : index
    %c0_27 = arith.constant 0 : index
    %79 = vector.load %arg2[%c6, %c0_26, %c0_27] : memref<9x4x1xf32, #tpu.memory_space<vmem>>, vector<1x4x1xf32>
    %80 = vector.shape_cast %79 : vector<1x4x1xf32> to vector<4x1xf32>
    %81 = vector.shape_cast %80 : vector<4x1xf32> to vector<1x4x1xf32>
    %82 = vector.broadcast %81 : vector<1x4x1xf32> to vector<2x4x256xf32>
    %83 = arith.mulf %30, %82 : vector<2x4x256xf32>
    %c7 = arith.constant 7 : index
    %c0_28 = arith.constant 0 : index
    %c0_29 = arith.constant 0 : index
    %84 = vector.load %arg2[%c7, %c0_28, %c0_29] : memref<9x4x1xf32, #tpu.memory_space<vmem>>, vector<1x4x1xf32>
    %85 = vector.shape_cast %84 : vector<1x4x1xf32> to vector<4x1xf32>
    %86 = vector.shape_cast %85 : vector<4x1xf32> to vector<1x4x1xf32>
    %87 = vector.broadcast %86 : vector<1x4x1xf32> to vector<2x4x256xf32>
    %88 = arith.mulf %0, %87 : vector<2x4x256xf32>
    %89 = arith.addf %83, %88 : vector<2x4x256xf32>
    %c8 = arith.constant 8 : index
    %c0_30 = arith.constant 0 : index
    %c0_31 = arith.constant 0 : index
    %90 = vector.load %arg2[%c8, %c0_30, %c0_31] : memref<9x4x1xf32, #tpu.memory_space<vmem>>, vector<1x4x1xf32>
    %91 = vector.shape_cast %90 : vector<1x4x1xf32> to vector<4x1xf32>
    %92 = vector.shape_cast %91 : vector<4x1xf32> to vector<1x4x1xf32>
    %93 = vector.broadcast %92 : vector<1x4x1xf32> to vector<2x4x256xf32>
    %94 = arith.mulf %35, %93 : vector<2x4x256xf32>
    %95 = arith.addf %89, %94 : vector<2x4x256xf32>
    %c240_i32_32 = arith.constant 240 : i32
    %96 = tpu.dynamic_rotate %95 by %c240_i32_32 dim 2 : vector<2x4x256xf32>, i32 -> vector<2x4x256xf32>
    %cst_33 = arith.constant 0.000000e+00 : f32
    %97 = vector.shape_cast %25 : vector<1x1x256xi1> to vector<1x1x256xi1>
    %98 = vector.broadcast %97 : vector<1x1x256xi1> to vector<2x4x256xi1>
    %99 = vector.broadcast %cst_33 : f32 to vector<2x4x256xf32>
    %100 = arith.select %98, %99, %96 : vector<2x4x256xi1>, vector<2x4x256xf32>
    %101 = arith.addf %56, %78 : vector<2x4x256xf32>
    %102 = arith.addf %101, %100 : vector<2x4x256xf32>
    %cst_34 = arith.constant 0.000000e+00 : f32
    %103 = vector.broadcast %cst_34 : f32 to vector<2x4x256xf32>
    %104 = arith.maximumf %102, %103 : vector<2x4x256xf32>
    %105 = vector.extract_strided_slice %104 {offsets = [0, 0, 0], sizes = [2, 1, 256], strides = [1, 1, 1]} : vector<2x4x256xf32> to vector<2x1x256xf32>
    %c0_35 = arith.constant 0 : index
    %c0_36 = arith.constant 0 : index
    %c0_37 = arith.constant 0 : index
    %106 = vector.load %arg4[%c0_35, %c0_36, %c0_37] : memref<4x8x1xf32, #tpu.memory_space<vmem>>, vector<1x8x1xf32>
    %107 = vector.shape_cast %106 : vector<1x8x1xf32> to vector<8x1xf32>
    %108 = vector.shape_cast %107 : vector<8x1xf32> to vector<1x8x1xf32>
    %109 = vector.broadcast %105 : vector<2x1x256xf32> to vector<2x8x256xf32>
    %110 = vector.broadcast %108 : vector<1x8x1xf32> to vector<2x8x256xf32>
    %111 = arith.mulf %109, %110 : vector<2x8x256xf32>
    %c0_38 = arith.constant 0 : index
    %c0_39 = arith.constant 0 : index
    %112 = vector.load %arg5[%c0_38, %c0_39] : memref<8x1xf32, #tpu.memory_space<vmem>>, vector<8x1xf32>
    %113 = vector.shape_cast %112 : vector<8x1xf32> to vector<1x8x1xf32>
    %114 = vector.broadcast %113 : vector<1x8x1xf32> to vector<2x8x256xf32>
    %115 = arith.addf %111, %114 : vector<2x8x256xf32>
    %116 = vector.extract_strided_slice %104 {offsets = [0, 1, 0], sizes = [2, 1, 256], strides = [1, 1, 1]} : vector<2x4x256xf32> to vector<2x1x256xf32>
    %c1_40 = arith.constant 1 : index
    %c0_41 = arith.constant 0 : index
    %c0_42 = arith.constant 0 : index
    %117 = vector.load %arg4[%c1_40, %c0_41, %c0_42] : memref<4x8x1xf32, #tpu.memory_space<vmem>>, vector<1x8x1xf32>
    %118 = vector.shape_cast %117 : vector<1x8x1xf32> to vector<8x1xf32>
    %119 = vector.shape_cast %118 : vector<8x1xf32> to vector<1x8x1xf32>
    %120 = vector.broadcast %116 : vector<2x1x256xf32> to vector<2x8x256xf32>
    %121 = vector.broadcast %119 : vector<1x8x1xf32> to vector<2x8x256xf32>
    %122 = arith.mulf %120, %121 : vector<2x8x256xf32>
    %123 = arith.addf %115, %122 : vector<2x8x256xf32>
    %124 = vector.extract_strided_slice %104 {offsets = [0, 2, 0], sizes = [2, 1, 256], strides = [1, 1, 1]} : vector<2x4x256xf32> to vector<2x1x256xf32>
    %c2_43 = arith.constant 2 : index
    %c0_44 = arith.constant 0 : index
    %c0_45 = arith.constant 0 : index
    %125 = vector.load %arg4[%c2_43, %c0_44, %c0_45] : memref<4x8x1xf32, #tpu.memory_space<vmem>>, vector<1x8x1xf32>
    %126 = vector.shape_cast %125 : vector<1x8x1xf32> to vector<8x1xf32>
    %127 = vector.shape_cast %126 : vector<8x1xf32> to vector<1x8x1xf32>
    %128 = vector.broadcast %124 : vector<2x1x256xf32> to vector<2x8x256xf32>
    %129 = vector.broadcast %127 : vector<1x8x1xf32> to vector<2x8x256xf32>
    %130 = arith.mulf %128, %129 : vector<2x8x256xf32>
    %131 = arith.addf %123, %130 : vector<2x8x256xf32>
    %132 = vector.extract_strided_slice %104 {offsets = [0, 3, 0], sizes = [2, 1, 256], strides = [1, 1, 1]} : vector<2x4x256xf32> to vector<2x1x256xf32>
    %c3_46 = arith.constant 3 : index
    %c0_47 = arith.constant 0 : index
    %c0_48 = arith.constant 0 : index
    %133 = vector.load %arg4[%c3_46, %c0_47, %c0_48] : memref<4x8x1xf32, #tpu.memory_space<vmem>>, vector<1x8x1xf32>
    %134 = vector.shape_cast %133 : vector<1x8x1xf32> to vector<8x1xf32>
    %135 = vector.shape_cast %134 : vector<8x1xf32> to vector<1x8x1xf32>
    %136 = vector.broadcast %132 : vector<2x1x256xf32> to vector<2x8x256xf32>
    %137 = vector.broadcast %135 : vector<1x8x1xf32> to vector<2x8x256xf32>
    %138 = arith.mulf %136, %137 : vector<2x8x256xf32>
    %139 = arith.addf %131, %138 : vector<2x8x256xf32>
    %cst_49 = arith.constant 0.000000e+00 : f32
    %140 = vector.broadcast %cst_49 : f32 to vector<2x8x256xf32>
    %141 = arith.maximumf %139, %140 : vector<2x8x256xf32>
    %c0_50 = arith.constant 0 : index
    %c0_51 = arith.constant 0 : index
    %c0_52 = arith.constant 0 : index
    %142 = vector.load %arg6[%c0_50, %c0_51, %c0_52] : memref<2x8x256xf32, #tpu.memory_space<vmem>>, vector<2x8x256xf32>
    tpu.vector_store %arg6[%c0_50, %c0_51, %c0_52], %141 {strides = array<i32>} : memref<2x8x256xf32, #tpu.memory_space<vmem>>, vector<2x8x256xf32>,
    return
  }
  func.func @transform_0(%arg0: i32) -> (i32, i32, i32) {
    %c0_i32 = arith.constant 0 : i32
    %c0_i32_0 = arith.constant 0 : i32
    %c0_i32_1 = arith.constant 0 : i32
    return %arg0, %c0_i32, %c0_i32_0 : i32, i32, i32
  }
  func.func @transform_1(%arg0: i32) -> (i32, i32, i32) {
    %c0_i32 = arith.constant 0 : i32
    %c0_i32_0 = arith.constant 0 : i32
    %c0_i32_1 = arith.constant 0 : i32
    %c0_i32_2 = arith.constant 0 : i32
    return %c0_i32, %c0_i32_0, %c0_i32_1 : i32, i32, i32
  }
  func.func @transform_2(%arg0: i32) -> (i32, i32) {
    %c0_i32 = arith.constant 0 : i32
    %c0_i32_0 = arith.constant 0 : i32
    %c0_i32_1 = arith.constant 0 : i32
    return %c0_i32, %c0_i32_0 : i32, i32
  }
  func.func @transform_3(%arg0: i32) -> (i32, i32, i32) {
    %c0_i32 = arith.constant 0 : i32
    %c0_i32_0 = arith.constant 0 : i32
    %c0_i32_1 = arith.constant 0 : i32
    %c0_i32_2 = arith.constant 0 : i32
    return %c0_i32, %c0_i32_0, %c0_i32_1 : i32, i32, i32
  }
  func.func @transform_4(%arg0: i32) -> (i32, i32) {
    %c0_i32 = arith.constant 0 : i32
    %c0_i32_0 = arith.constant 0 : i32
    %c0_i32_1 = arith.constant 0 : i32
    return %c0_i32, %c0_i32_0 : i32, i32
  }
  func.func @transform_5(%arg0: i32) -> (i32, i32, i32) {
    %c0_i32 = arith.constant 0 : i32
    %c0_i32_0 = arith.constant 0 : i32
    %c0_i32_1 = arith.constant 0 : i32
    return %arg0, %c0_i32, %c0_i32_0 : i32, i32, i32
  }
}

</mosaic_0001>

<bundles_post_ra>
// kernel: tpu_custom_call.1
= control target key start
LH: loop header
LB: loop body
LE: loop exit
PB: predicated region body
PF: predicated region fallthrough
CT: control target
= control target key end

     0   :  { %v524_v2 = vmov 0   ;;  %s722_s0 = inlined_call_operand.vmem [shape: f32[2,4,256], index: 0, kind: input, shape index: {}]   ;;  %s723_s1 = inlined_call_operand.vmem [shape: f32[9,4,1], index: 1, kind: input, shape index: {}]   ;;  %s724_s2 = inlined_call_operand.vmem [shape: f32[4,1], index: 2, kind: input, shape index: {}]   ;;  %s725_s3 = inlined_call_operand.vmem [shape: f32[4,8,1], index: 3, kind: input, shape index: {}]   ;;  %s726_s4 = inlined_call_operand.vmem [shape: f32[8,1], index: 4, kind: input, shape index: {}]   ;;  %s727_s5 = inlined_call_operand.hbm [shape: f32[2,8,256], index: 5, kind: output, shape index: {}]  }
   0x1   :  { %v168_v0 = vld [vmem:[%s723_s1] sm:$0xf]  ;;  %v480_v1 = vld [vmem:[%s723_s1 + $0x4] sm:$0xf]  ;;  %497 = vset.pattern.permute.xlu1 %v524_v2  ;;  %496 = vset.pattern.permute.xlu0 %v524_v2  ;;  %v481_v3 = vld [vmem:[%s723_s1 + $0x8] sm:$0xf] }
   0x2   :  { %171 = vperm.xlu1 %497, %v168_v0   ;;  %182 = vperm.xlu0 %496, %v480_v1   ;;  %v483_v4 = vld [vmem:[%s723_s1 + $0x1c] sm:$0xf] }
   0x3   :  { %10 = vsyncpa [#allocation3], 0  ;;  %v484_v5 = vld [vmem:[%s723_s1 + $0x20] sm:$0xf]  ;;  %v482_v6 = vld [vmem:[%s723_s1 + $0x18] sm:$0xf]  ;;  %v23_v20 = vlaneseq }
   0x4   :  { %v583_v7 = vld [vmem:[%s722_s0 + $0x8] sm:$0xff]  ;;  %v588_v8 = vld [vmem:[%s722_s0] sm:$0xff]  ;;  %s525_s9 = smov 1   ;;  %s526_s10 = smov 127   ;;  %v478_v12 = vld [vmem:[%s723_s1 + $0x10] sm:$0xf] }
   0x5   :  { %v61_v9 = vcombine.high %v583_v7, %v583_v7  ;;  %v60_v10 = vcombine.high %v588_v8, %v588_v8  ;;  %v477_v11 = vld [vmem:[%s723_s1 + $0xc] sm:$0xf]  ;;  %v479_v13 = vld [vmem:[%s723_s1 + $0x14] sm:$0xf]  ;;  %v117_v14 = vld [vmem:[%s724_s2] sm:$0xf] }
   0x6   :  { %208 = vperm.xlu1 %497, %v481_v3   ;;  %254 = vperm.xlu0 %496, %v483_v4   ;;  %v324_v15 = vld [vmem:[%s725_s3] sm:$0xff]  ;;  %v527_v18 = vmov 839922192   ;;  %v615_v23 = vand.u32 127, %v23_v20  ;;  %v617_v25 = vshrl.u32 %v23_v20, 7  ;;  %s528_s1 = smov 16  }
   0x7   :  { %v134_v19 = vunpack.c.l.s4 %v527_v18  ;;  %s529_s2 = smov 112  }
   0x8   :  { %v622_v28 = vadd.s32 128, %v615_v23  ;;  %v30_v32 = vand.u32 15, %v615_v23  ;;  %vm72_vm0 = vcmp.lt.s32.totalorder %v615_v23, 1  ;;  %vm93_vm5 = vcmp.lt.s32.totalorder %v615_v23, 127 }
   0x9   :  { %v135_v24 = vunpack.c.0.s8 %v134_v19  ;;  %vm54_vm6 = vcmp.lt.s32.totalorder %v615_v23, 16  ;;  %vm299_vm7 = vcmp.lt.s32.totalorder %v615_v23, 112 }
   0xa   :  { %280 = vperm.xlu1 %497, %v484_v5   ;;  %243 = vperm.xlu0 %496, %v482_v6   ;;  %v37_v33 = vand.u32 15, %v622_v28  ;;  %vm50_vm1 = vcmp.eq.s32.totalorder %v30_v32, 0  ;;  %vm642_vm3 = vcmp.eq.s32.totalorder %v30_v32, 15  ;;  %vm57_vm8 = vcmp.ge.s32.totalorder %v622_v28, 240 }
   0xb   :  { %v138_v29 = vsub.s32 %v135_v24, %v617_v25 }
   0xc   :  { %vm628_vm2 = vcmp.eq.s32.totalorder %v37_v33, 0  ;;  %vm646_vm4 = vcmp.eq.s32.totalorder %v37_v33, 15 }
   0xe   :  { %66 = vrot.lane.b32.xlu1 %v583_v7, %s525_s9  ;;  %64 = vrot.lane.b32.xlu0 %v588_v8, %s525_s9 }
  0x12   :  { %70 = vrot.lane.b32.xlu1 %v61_v9, %s525_s9  ;;  %68 = vrot.lane.b32.xlu0 %v60_v10, %s525_s9 }
  0x16   :  { %87 = vrot.lane.b32.xlu1 %v583_v7, %s526_s10  ;;  %85 = vrot.lane.b32.xlu0 %v588_v8, %s526_s10 }
  0x1a   :  { %91 = vrot.lane.b32.xlu1 %v61_v9, %s526_s10  ;;  %89 = vrot.lane.b32.xlu0 %v60_v10, %s526_s10 }
  0x1e   :  { %110 = vperm.xlu1 %497, %v477_v11   ;;  %131 = vperm.xlu0 %496, %v478_v12  }
  0x22   :  { %157 = vperm.xlu1 %497, %v479_v13   ;;  %120 = vperm.xlu0 %496, %v117_v14  }
  0x26   :  { %343 = vperm.xlu0 %496, %v324_v15  }
  0x81   :  { %v172_v16 = vpop.permute.xlu1 %171  ;;  %v183_v17 = vpop.permute.xlu0 %182 }
  0x82   :  { %v190_v34 = vrot.slane %v183_v17, %v138_v29 }
  0x84   :  { %v192_v40 = vmul.f32 %v190_v34, %v588_v8  ;;  %v193_v41 = vmul.f32 %v190_v34, %v583_v7 }
  0x85   :  { %v613_v21 = vpop.permute.xlu1 %208  ;;  %v255_v22 = vpop.permute.xlu0 %254 }
  0x86   :  { %v262_v35 = vrot.slane %v255_v22, %v138_v29  ;;  %v196_v53 = vcombine.high %v192_v40, %v192_v40  ;;  %v197_v54 = vcombine.high %v193_v41, %v193_v41 }
  0x88   :  { %v635_v44 = vmul.f32 %v262_v35, %v588_v8  ;;  %v638_v45 = vmul.f32 %v262_v35, %v583_v7 }
  0x89   :  { %v619_v26 = vpop.permute.xlu1 %280  ;;  %v244_v27 = vpop.permute.xlu0 %243 }
  0x8a   :  { %v268_v56 = vcombine.high %v635_v44, %v635_v44  ;;  %v269_v60 = vcombine.high %v638_v45, %v638_v45 }
  0x8d   :  { %v67_v30 = vpop.permute.xlu1 %66  ;;  %v65_v31 = vpop.permute.xlu0 %64 }
  0x91   :  { %v71_v36 = vpop.permute.xlu1 %70  ;;  %v69_v37 = vpop.permute.xlu0 %68 }
  0x92   :  { %v76_v39 = vsel %vm72_vm0, %v71_v36, %v67_v30  ;;  %v74_v42 = vsel %vm72_vm0, %v67_v30, %v71_v36  ;;  %v75_v43 = vsel %vm72_vm0, %v69_v37, %v65_v31  ;;  %v73_v47 = vsel %vm72_vm0, %v65_v31, %v69_v37 }
  0x93   :  { %v83_v46 = vsel %vm50_vm1, 0.0, %v76_v39  ;;  %v84_v50 = vsel %vm628_vm2, 0.0, %v74_v42  ;;  %v81_v51 = vsel %vm50_vm1, 0.0, %v75_v43  ;;  %v82_v59 = vsel %vm628_vm2, 0.0, %v73_v47 }
  0x94   :  { %v176_v57 = vmul.f32 %v172_v16, %v83_v46  ;;  %v248_v58 = vmul.f32 %v244_v27, %v83_v46  ;;  %v177_v61 = vmul.f32 %v172_v16, %v84_v50  ;;  %v174_v62 = vmul.f32 %v172_v16, %v81_v51 }
  0x95   :  { %v88_v48 = vpop.permute.xlu1 %87  ;;  %v86_v49 = vpop.permute.xlu0 %85  ;;  %v246_v63 = vmul.f32 %v244_v27, %v81_v51  ;;  %v657_v6 = vmul.f32 %v244_v27, %v84_v50  ;;  %v175_v9 = vmul.f32 %v172_v16, %v82_v59  ;;  %v247_v12 = vmul.f32 %v244_v27, %v82_v59 }
  0x96   :  { %v202_v14 = vadd.f32 %v193_v41, %v176_v57  ;;  %v274_v15 = vadd.f32 %v638_v45, %v248_v58  ;;  %v200_v22 = vadd.f32 %v192_v40, %v174_v62  ;;  %v203_v31 = vadd.f32 %v197_v54, %v177_v61  ;;  %v486_v45 = vld [vmem:[%s725_s3 + $0x10] sm:$0xff] }
  0x97   :  { %v272_v30 = vadd.f32 %v635_v44, %v246_v63  ;;  %v201_v35 = vadd.f32 %v196_v53, %v175_v9  ;;  %v273_v9 = vadd.f32 %v268_v56, %v247_v12  ;;  %v487_v44 = vld [vmem:[%s725_s3 + $0x18] sm:$0xff] }
  0x99   :  { %v92_v0 = vpop.permute.xlu1 %91  ;;  %v90_v1 = vpop.permute.xlu0 %89 }
  0x9a   :  { %v95_v2 = vsel %vm93_vm5, %v88_v48, %v92_v0  ;;  %v97_v3 = vsel %vm93_vm5, %v92_v0, %v88_v48  ;;  %v94_v4 = vsel %vm93_vm5, %v86_v49, %v90_v1  ;;  %v96_v5 = vsel %vm93_vm5, %v90_v1, %v86_v49 }
  0x9b   :  { %v104_v10 = vsel %vm642_vm3, 0.0, %v95_v2  ;;  %v102_v11 = vsel %vm642_vm3, 0.0, %v94_v4  ;;  %v105_v17 = vsel %vm646_vm4, 0.0, %v97_v3  ;;  %v103_v18 = vsel %vm646_vm4, 0.0, %v96_v5 }
  0x9c   :  { %v213_v13 = vmul.f32 %v613_v21, %v104_v10  ;;  %v211_v16 = vmul.f32 %v613_v21, %v102_v11  ;;  %v285_v24 = vmul.f32 %v619_v26, %v104_v10  ;;  %v283_v27 = vmul.f32 %v619_v26, %v102_v11 }
  0x9d   :  { %v111_v19 = vpop.permute.xlu1 %110  ;;  %v132_v20 = vpop.permute.xlu0 %131  ;;  %v214_v36 = vmul.f32 %v613_v21, %v105_v17  ;;  %v286_v37 = vmul.f32 %v619_v26, %v105_v17  ;;  %v212_v38 = vmul.f32 %v613_v21, %v103_v18  ;;  %v284_v55 = vmul.f32 %v619_v26, %v103_v18 }
  0x9e   :  { %v139_v32 = vrot.slane %v132_v20, %v138_v29  ;;  %v217_v33 = vadd.f32 %v213_v13, %v202_v14  ;;  %v215_v34 = vadd.f32 %v211_v16, %v200_v22  ;;  %v113_v39 = vmul.f32 %v111_v19, %v81_v51  ;;  %v350_v13 = vld [vmem:[%s726_s4] sm:$0xff]  ;;  %v485_v14 = vld [vmem:[%s725_s3 + $0x8] sm:$0xff]  ;;  %s530_s3 = smov [#allocation2]  }
  0x9f   :  { %v114_v41 = vmul.f32 %v111_v19, %v82_v59  ;;  %v115_v47 = vmul.f32 %v111_v19, %v83_v46  ;;  %v116_v48 = vmul.f32 %v111_v19, %v84_v50  ;;  %v289_v49 = vadd.f32 %v285_v24, %v274_v15  ;;  %s466_s4 = sshll.u32 %s530_s3, 4  ;;  %s467_s4 = int_to_ptr.vmem [resolvable:$true] %s466_s4 }
  0xa0   :  { %v141_v40 = vmul.f32 %v139_v32, %v588_v8  ;;  %v142_v42 = vmul.f32 %v139_v32, %v583_v7  ;;  %221 = vrot.lane.b32.xlu1 %v217_v33, %s528_s1  ;;  %219 = vrot.lane.b32.xlu0 %v215_v34, %s528_s1  ;;  %v287_v52 = vadd.f32 %v283_v27, %v272_v30  ;;  %s500_s28 = scalar_lea.vmem %s467_s4, 512  ;;  %p505_p1 = scmp.lt.s32.totalorder %s467_s4, %s467_s4 }
  0xa1   :  { %v158_v29 = vpop.permute.xlu1 %157  ;;  %v121_v43 = vpop.permute.xlu0 %120  ;;  %v218_v0 = vadd.f32 %v214_v36, %v203_v31  ;;  %v216_v1 = vadd.f32 %v212_v38, %v201_v35  ;;  %v275_v26 = vadd.f32 %v269_v60, %v657_v6  ;;  %p501_p0 = scmp.ne.s32.totalorder %s467_s4, %s500_s28  ;;  %p506_p2 = scmp.lt.s32.totalorder %s500_s28, %s500_s28 }
  0xa2   :  { %v145_v53 = vcombine.high %v141_v40, %v141_v40  ;;  %v146_v54 = vcombine.high %v142_v42, %v142_v42  ;;  %v123_v21 = vadd.f32 %v121_v43, %v113_v39  ;;  %v124_v51 = vadd.f32 %v121_v43, %v114_v41 }
  0xa3   :  { %v160_v8 = vmul.f32 %v158_v29, %v102_v11  ;;  %v125_v57 = vadd.f32 %v121_v43, %v115_v47  ;;  %v126_v7 = vadd.f32 %v121_v43, %v116_v48  ;;  %v161_v58 = vmul.f32 %v158_v29, %v103_v18  ;;  %p507_p3 = por %p506_p2, %p505_p1 }
  0xa4   :  { %293 = vrot.lane.b32.xlu1 %v289_v49, %s529_s2  ;;  %291 = vrot.lane.b32.xlu0 %v287_v52, %s529_s2  ;;  %v149_v59 = vadd.f32 %v141_v40, %v123_v21  ;;  %v150_v61 = vadd.f32 %v145_v53, %v124_v51  ;;  %v162_v62 = vmul.f32 %v158_v29, %v104_v10  ;;  %v327_v47 = vsub.s32 0, %v617_v25 }
  0xa5   :  { %v163_v46 = vmul.f32 %v158_v29, %v105_v17  ;;  %v151_v50 = vadd.f32 %v142_v42, %v125_v57  ;;  %v152_v63 = vadd.f32 %v146_v54, %v126_v7  ;;  %v290_v10 = vadd.f32 %v286_v37, %v275_v26  ;;  %v344_v56 = vpop.permute.xlu0 %343  ;;  %p508_p4 = pnand %p507_p3, %p501_p0 }
  0xa6   :  { %v164_v2 = vadd.f32 %v160_v8, %v149_v59  ;;  %v165_v3 = vadd.f32 %v161_v58, %v150_v61  ;;  %v288_v11 = vadd.f32 %v284_v55, %v273_v9  ;;  %v364_v53 = vsub.s32 1, %v617_v25 }
  0xa7   :  { %v166_v4 = vadd.f32 %v162_v62, %v151_v50  ;;  %v167_v5 = vadd.f32 %v163_v46, %v152_v63  ;;  %v395_v8 = vsub.s32 2, %v617_v25  ;;  %v426_v57 = vsub.s32 3, %v617_v25 }
  0xa8   :  { %225 = vrot.lane.b32.xlu1 %v218_v0, %s528_s1  ;;  %223 = vrot.lane.b32.xlu0 %v216_v1, %s528_s1 }
  0xac   :  { %297 = vrot.lane.b32.xlu1 %v290_v10, %s529_s2  ;;  %295 = vrot.lane.b32.xlu0 %v288_v11, %s529_s2 }
  0xb0   :  { %353 = vperm.xlu1 %497, %v350_v13   ;;  %380 = vperm.xlu0 %496, %v485_v14  }
  0xb4   :  { %411 = vperm.xlu1 %497, %v486_v45   ;;  %442 = vperm.xlu0 %496, %v487_v44  }
 0x112   :  { %v222_v60 = vpop.permute.xlu1 %221  ;;  %v220_v6 = vpop.permute.xlu0 %219 }
 0x116   :  { %v294_v12 = vpop.permute.xlu1 %293  ;;  %v292_v15 = vpop.permute.xlu0 %291 }
 0x11a   :  { %v226_v17 = vpop.permute.xlu1 %225  ;;  %v224_v18 = vpop.permute.xlu0 %223 }
 0x11b   :  { %v230_v16 = vsel %vm54_vm6, %v226_v17, %v222_v60  ;;  %v229_v19 = vsel %vm54_vm6, %v224_v18, %v220_v6  ;;  %v228_v24 = vsel %vm54_vm6, %v222_v60, %v226_v17  ;;  %v227_v27 = vsel %vm54_vm6, %v220_v6, %v224_v18 }
 0x11c   :  { %v237_v20 = vsel %vm54_vm6, 0.0, %v230_v16  ;;  %v235_v22 = vsel %vm54_vm6, 0.0, %v229_v19  ;;  %v315_v38 = vadd.f32 %v228_v24, %v167_v5  ;;  %v313_v39 = vadd.f32 %v227_v27, %v165_v3 }
 0x11d   :  { %v314_v30 = vadd.f32 %v237_v20, %v166_v4  ;;  %v312_v31 = vadd.f32 %v235_v22, %v164_v2 }
 0x11e   :  { %v298_v32 = vpop.permute.xlu1 %297  ;;  %v296_v33 = vpop.permute.xlu0 %295 }
 0x11f   :  { %v301_v34 = vsel %vm299_vm7, %v294_v12, %v298_v32  ;;  %v303_v35 = vsel %vm299_vm7, %v298_v32, %v294_v12  ;;  %v300_v36 = vsel %vm299_vm7, %v292_v15, %v296_v33  ;;  %v302_v37 = vsel %vm299_vm7, %v296_v33, %v292_v15 }
 0x120   :  { %v311_v41 = vsel %vm57_vm8, 0.0, %v303_v35  ;;  %v309_v40 = vsel %vm57_vm8, 0.0, %v302_v37  ;;  %v318_v42 = vadd.f32 %v314_v30, %v301_v34  ;;  %v316_v43 = vadd.f32 %v312_v31, %v300_v36 }
 0x121   :  { %v319_v29 = vadd.f32 %v315_v38, %v311_v41  ;;  %v317_v23 = vadd.f32 %v313_v39, %v309_v40 }
 0x122   :  { %v322_v48 = vmax.f32 %v318_v42, 0.0  ;;  %v320_v49 = vmax.f32 %v316_v43, 0.0 }
 0x123   :  { %v323_v28 = vmax.f32 %v319_v29, 0.0  ;;  %v321_v52 = vmax.f32 %v317_v23, 0.0 }
 0x124   :  { %v328_v54 = vrot.slane %v320_v49, %v327_v47  ;;  %v336_v51 = vrot.slane %v322_v48, %v327_v47  ;;  %v365_v7 = vrot.slane %v320_v49, %v364_v53  ;;  %v373_v59 = vrot.slane %v322_v48, %v364_v53 }
 0x125   :  { %v332_v21 = vrot.slane %v321_v52, %v327_v47  ;;  %v340_v55 = vrot.slane %v323_v28, %v327_v47  ;;  %v369_v58 = vrot.slane %v321_v52, %v364_v53  ;;  %v377_v61 = vrot.slane %v323_v28, %v364_v53 }
 0x126   :  { %v346_v62 = vmul.f32 %v344_v56, %v328_v54  ;;  %v348_v50 = vmul.f32 %v344_v56, %v336_v51  ;;  %v396_v2 = vrot.slane %v320_v49, %v395_v8  ;;  %v400_v3 = vrot.slane %v321_v52, %v395_v8 }
 0x127   :  { %v347_v46 = vmul.f32 %v344_v56, %v332_v21  ;;  %v349_v63 = vmul.f32 %v344_v56, %v340_v55  ;;  %v404_v4 = vrot.slane %v322_v48, %v395_v8  ;;  %v408_v5 = vrot.slane %v323_v28, %v395_v8 }
 0x128   :  { %v427_v44 = vrot.slane %v320_v49, %v426_v57  ;;  %v431_v60 = vrot.slane %v321_v52, %v426_v57  ;;  %v435_v6 = vrot.slane %v322_v48, %v426_v57  ;;  %v439_v12 = vrot.slane %v323_v28, %v426_v57 }
 0x12f   :  { %v354_v0 = vpop.permute.xlu1 %353  ;;  %v381_v1 = vpop.permute.xlu0 %380 }
 0x130   :  { %v356_v26 = vadd.f32 %v354_v0, %v346_v62  ;;  %v357_v9 = vadd.f32 %v354_v0, %v347_v46  ;;  %v358_v10 = vadd.f32 %v354_v0, %v348_v50  ;;  %v359_v11 = vadd.f32 %v354_v0, %v349_v63 }
 0x131   :  { %v383_v13 = vmul.f32 %v381_v1, %v365_v7  ;;  %v384_v25 = vmul.f32 %v381_v1, %v369_v58  ;;  %v385_v14 = vmul.f32 %v381_v1, %v373_v59  ;;  %v386_v45 = vmul.f32 %v381_v1, %v377_v61 }
 0x133   :  { %v412_v15 = vpop.permute.xlu1 %411  ;;  %v387_v56 = vadd.f32 %v383_v13, %v356_v26  ;;  %v388_v17 = vadd.f32 %v384_v25, %v357_v9  ;;  %v389_v18 = vadd.f32 %v385_v14, %v358_v10  ;;  %v390_v16 = vadd.f32 %v386_v45, %v359_v11  ;;  %v443_v19 = vpop.permute.xlu0 %442 }
 0x134   :  { %v414_v20 = vmul.f32 %v412_v15, %v396_v2  ;;  %v415_v22 = vmul.f32 %v412_v15, %v400_v3  ;;  %v416_v24 = vmul.f32 %v412_v15, %v404_v4  ;;  %v417_v27 = vmul.f32 %v412_v15, %v408_v5 }
 0x135   :  { %v445_v30 = vmul.f32 %v443_v19, %v427_v44  ;;  %v446_v31 = vmul.f32 %v443_v19, %v431_v60  ;;  %v447_v32 = vmul.f32 %v443_v19, %v435_v6  ;;  %v448_v33 = vmul.f32 %v443_v19, %v439_v12 }
 0x136   :  { %v418_v34 = vadd.f32 %v414_v20, %v387_v56  ;;  %v419_v35 = vadd.f32 %v415_v22, %v388_v17  ;;  %v420_v36 = vadd.f32 %v416_v24, %v389_v18  ;;  %v421_v37 = vadd.f32 %v417_v27, %v390_v16 }
 0x138   :  { %v449_v38 = vadd.f32 %v445_v30, %v418_v34  ;;  %v450_v39 = vadd.f32 %v446_v31, %v419_v35  ;;  %v451_v41 = vadd.f32 %v447_v32, %v420_v36  ;;  %v452_v40 = vadd.f32 %v448_v33, %v421_v37 }
 0x13a   :  { %v453_v42 = vmax.f32 %v449_v38, 0.0  ;;  %v454_v29 = vmax.f32 %v450_v39, 0.0  ;;  %v455_v43 = vmax.f32 %v451_v41, 0.0  ;;  %v456_v23 = vmax.f32 %v452_v40, 0.0 }
 0x13c   :  { %457 = vst [vmem:[#allocation2] sm:$0xff] %v453_v42  ;;  %458 = vst [vmem:[#allocation2 + $0x8] sm:$0xff] %v454_v29 }
 0x13d   :  { %459 = vst [vmem:[#allocation2 + $0x10] sm:$0xff] %v455_v43  ;;  %460 = vst [vmem:[#allocation2 + $0x18] sm:$0xff] %v456_v23 }
 0x13e   :  { %511 = shalt.err (!%p508_p4)
}
 0x13f   :  { %s512_s6 = scalar_lea.hbm %s727_s5, 512 }
 0x140   :  { %p513_p5 = scmp.ne.s32.totalorder %s727_s5, %s512_s6  ;;  %p516_p6 = scmp.lt.u32.totalorder %s512_s6, %s727_s5 }
 0x142   :  { %p518_p7 = pnand %p516_p6, %p513_p5 }
 0x144   :  { %521 = shalt.err (!%p518_p7)
}
 0x145   :  { %s531_s0 = smov 256  }
 0x146   :  { %472 = dma.vmem_to_hbm [thread:$0]  %s467_s4, 512, %s727_s5, [#allocation3], %s531_s0, %s531_s0, %s528_s1  }
 0x147   :  { %522 = dma.done.wait [#allocation3], 512  }
 0x148   :  { %523 = vsyncadd [#allocation3], 4294966784 }
 0x149   :  { %476 = vsyncpa [#allocation3], 1 }

</bundles_post_ra>
